<compile_context>
chip_gen: v7x
topology: tpu7x:2x2x1
jax: 0.10.0
libtpu: 0.0.40
codegen_flags: <defaults>
</compile_context>

<pallas_src>
import functools

import jax
import jax.numpy as jnp
from jax.experimental import pallas as pl
from jax.experimental.pallas import tpu as pltpu


def _round_up(x, m):
    return ((x + m - 1) // m) * m


def _prep_kernel(o1_ref, o2_ref, stk_ref, pos_ref, *, inv_temp):
    """Row-normalize both views; emit stacked bf16 features + f32 positive logits."""
    f32 = jnp.float32
    o1 = o1_ref[...].astype(f32)
    o2 = o2_ref[...].astype(f32)
    # F.normalize(x, dim=1) = x / max(||x||_2, eps), eps = 1e-12.
    # rsqrt(max(sumsq, eps^2)) == 1 / max(||x||, eps) and runs on the EUP.
    eps2 = f32(1e-24)
    inv1 = jax.lax.rsqrt(jnp.maximum(jnp.sum(o1 * o1, axis=1, keepdims=True), eps2))
    inv2 = jax.lax.rsqrt(jnp.maximum(jnp.sum(o2 * o2, axis=1, keepdims=True), eps2))
    n1 = (o1 * inv1).astype(stk_ref.dtype)
    n2 = (o2 * inv2).astype(stk_ref.dtype)
    stk_ref[0] = n1
    stk_ref[1] = n2
    # Positive logit for row i is dot(n1[i], n2[i]) / temp, computed from the
    # bf16-rounded features so it is consistent with the phase-2 denominator.
    pos_ref[...] = jnp.sum(n1.astype(f32) * n2.astype(f32), axis=1,
                           keepdims=True) * f32(inv_temp)


def _ntxent_lse_kernel(rows_ref, cols_ref, lse_ref, l_sc, m_sc=None, *,
                       inv_temp, tile, bs, b_pad, use_fixed_max):
    """Tiled similarity + per-row logsumexp (fixed-max or flash-style online)."""
    f32 = jnp.float32
    i = pl.program_id(0)
    j = pl.program_id(1)

    # (tile, F) x (tile, F) contracted on the feature axis -> (tile, tile).
    # bf16 inputs, f32 accumulation on the MXU; no explicit transpose.
    s = jax.lax.dot_general(
        rows_ref[...], cols_ref[...],
        dimension_numbers=(((1,), (1,)), ((), ())),
        preferred_element_type=f32) * f32(inv_temp)

    # Mask the global diagonal (self-similarity) and, only if row padding
    # exists, the padded column bands -- using (tile,1)/(1,tile) broadcast
    # iotas, never (n,n) index matrices.
    row_ids = i * tile + jax.lax.broadcasted_iota(jnp.int32, (tile, 1), 0)
    col_ids = j * tile + jax.lax.broadcasted_iota(jnp.int32, (1, tile), 1)
    keep = row_ids != col_ids
    if bs < b_pad:   # static: valid columns are [0, bs) and [b_pad, b_pad+bs)
        keep = keep & ((col_ids < bs) |
                       ((col_ids >= b_pad) & (col_ids < b_pad + bs)))
    s = jnp.where(keep, s, f32(-1e30))

    if use_fixed_max:
        # L2-normalized features => every logit is bounded by 1/temp, so a
        # fixed max is exact: no cross-lane max, no rescale, single scratch.
        @pl.when(j == 0)
        def _():
            l_sc[...] = jnp.zeros_like(l_sc)

        l_sc[...] += jnp.sum(jnp.exp(s - f32(inv_temp)), axis=1, keepdims=True)

        @pl.when(j == pl.num_programs(1) - 1)
        def _():
            lse_ref[...] = f32(inv_temp) + jnp.log(l_sc[...])
    else:
        # Online (flash-style) logsumexp fallback for very small temperatures.
        @pl.when(j == 0)
        def _():
            m_sc[...] = jnp.full_like(m_sc, -jnp.inf)
            l_sc[...] = jnp.zeros_like(l_sc)

        m_prev = m_sc[...]
        m_new = jnp.maximum(m_prev, jnp.max(s, axis=1, keepdims=True))
        alpha = jnp.exp(m_prev - m_new)
        l_sc[...] = alpha * l_sc[...] + jnp.sum(jnp.exp(s - m_new), axis=1,
                                                keepdims=True)
        m_sc[...] = m_new

        @pl.when(j == pl.num_programs(1) - 1)
        def _():
            lse_ref[...] = m_sc[...] + jnp.log(l_sc[...])


def _vmem_capacity_bytes():
    try:
        return max(int(pltpu.get_tpu_info().vmem_capacity_bytes),
                   32 * 1024 * 1024)
    except Exception:
        return 64 * 1024 * 1024   # assume the most restrictive part (v7x per-TC)


@functools.partial(jax.jit, static_argnames=("temperature",))
def ntxent_loss(out1, out2, temperature=0.5):
    bs, feat = out1.shape
    assert out2.shape == (bs, feat)
    inv_temp = 1.0 / float(temperature)
    # exp(logit - 1/temp) >= exp(-2/temp): safe in f32 down to temp ~ 1/30.
    use_fixed_max = inv_temp <= 30.0

    f_lanes = _round_up(feat, 128)            # lanes actually occupied in VMEM
    vmem_cap = _vmem_capacity_bytes()

    # ---- Phase-2 tile: as large as the VMEM budget allows (phase 2 is HBM- and
    # step-overhead-bound at small tiles); 512 on 64 MiB parts, 1024 on 128 MiB.
    budget2 = (vmem_cap * 7) // 10
    tile = 256
    for cand in (512, 1024):
        if cand == 1024 and vmem_cap < 96 * 1024 * 1024:
            continue                           # keep v7x (64 MiB/TC) at <= 512
        if 8 * cand * f_lanes + 16 * cand * cand <= budget2:
            tile = cand
    # Small batches: shrink the tile to the batch.  b_pad is a multiple of tile,
    # so the phase-2 row-tile count 2*b_pad//tile is always even (>= 2) and both
    # v7x TensorCores get row tiles.
    tile = min(tile, max(16, _round_up(bs, 16)))
    b_pad = _round_up(bs, tile)
    n_pad = 2 * b_pad

    # ---- Phase-1 row tile: a divisor of tile that fits its VMEM footprint
    # (~40 B per row per lane: f32 inputs x2 double-buffered, bf16 stacked
    # output double-buffered, f32 temps).
    budget1 = min(budget2, 48 * 1024 * 1024)
    tile_p = min(tile, 256)
    while (40 * tile_p * f_lanes > budget1 and tile_p % 2 == 0
           and (tile_p // 2) % 8 == 0 and b_pad % (tile_p // 2) == 0):
        tile_p //= 2

    vmem_limit1 = int(min((vmem_cap * 17) // 20,
                          max(32 * 1024 * 1024,
                              60 * tile_p * f_lanes + (4 << 20))))
    vmem_limit2 = int(min((vmem_cap * 17) // 20,
                          max(32 * 1024 * 1024,
                              int(1.5 * (8 * tile * f_lanes + 16 * tile * tile))
                              + (4 << 20))))

    # Rows are padded to the tile grid only when needed; the feature dim is
    # never padded (BlockSpec last dim == full array dim; MXU masks the tail).
    if b_pad > bs:
        o1 = jnp.pad(out1, ((0, b_pad - bs), (0, 0)))
        o2 = jnp.pad(out2, ((0, b_pad - bs), (0, 0)))
    else:
        o1, o2 = out1, out2

    # ---- Phase 1: normalization + positive logits + stacked bf16 features.
    stacked, pos = pl.pallas_call(
        functools.partial(_prep_kernel, inv_temp=inv_temp),
        grid=(b_pad // tile_p,),
        in_specs=[pl.BlockSpec((tile_p, feat), lambda i: (i, 0)),
                  pl.BlockSpec((tile_p, feat), lambda i: (i, 0))],
        out_specs=[pl.BlockSpec((2, tile_p, feat), lambda i: (0, i, 0)),
                   pl.BlockSpec((tile_p, 1), lambda i: (i, 0))],
        out_shape=[jax.ShapeDtypeStruct((2, b_pad, feat), jnp.bfloat16),
                   jax.ShapeDtypeStruct((b_pad, 1), jnp.float32)],
        compiler_params=pltpu.CompilerParams(
            dimension_semantics=("parallel",),
            vmem_limit_bytes=vmem_limit1),
    )(o1, o2)

    # reps = cat([n1_padded, n2_padded], dim=0) is a free contiguous reshape of
    # the stacked phase-1 output -- no extra HBM round trip.
    reps = stacked.reshape(2 * b_pad, feat)

    # ---- Phase 2: tiled (n_pad, n_pad) similarity with per-row logsumexp.
    scratch = [pltpu.VMEM((tile, 1), jnp.float32)]            # running sum l
    if not use_fixed_max:
        scratch.append(pltpu.VMEM((tile, 1), jnp.float32))    # running max m
    lse = pl.pallas_call(
        functools.partial(_ntxent_lse_kernel, inv_temp=inv_temp, tile=tile,
                          bs=bs, b_pad=b_pad, use_fixed_max=use_fixed_max),
        grid=(n_pad // tile, n_pad // tile),
        in_specs=[pl.BlockSpec((tile, feat), lambda i, j: (i, 0)),   # row tile
                  pl.BlockSpec((tile, feat), lambda i, j: (j, 0))],  # col tile
        out_specs=pl.BlockSpec((tile, 1), lambda i, j: (i, 0)),
        out_shape=jax.ShapeDtypeStruct((n_pad, 1), jnp.float32),
        scratch_shapes=scratch,
        compiler_params=pltpu.CompilerParams(
            dimension_semantics=("parallel", "arbitrary"),
            vmem_limit_bytes=vmem_limit2),
    )(reps, reps)

    # CrossEntropyLoss(reduction='mean') over the 2*bs valid rows:
    #   mean_r (logsumexp_r - positive_logit_r); the positive logit is the same
    #   for row i and row b_pad+i (dot(n1[i], n2[i]) / temp).
    pos_v = pos[:bs, 0]
    lse_a = lse[:bs, 0]
    lse_b = lse[b_pad:b_pad + bs, 0]
    return 0.5 * (jnp.mean(lse_a - pos_v) + jnp.mean(lse_b - pos_v))


def _ntxent_ref(out1, out2, temperature=0.5):
    """Pure-JAX reference mirroring the PyTorch forward (no memory bank)."""
    bs = out1.shape[0]
    eps = 1e-12
    n1 = out1 / jnp.maximum(jnp.linalg.norm(out1, axis=1, keepdims=True), eps)
    n2 = out2 / jnp.maximum(jnp.linalg.norm(out2, axis=1, keepdims=True), eps)
    reps = jnp.concatenate([n1, n2], axis=0)
    logits = reps @ reps.T / temperature
    n = 2 * bs
    mask = ~jnp.eye(n, dtype=bool)
    logits = logits[mask].reshape(n, n - 1)
    labels = jnp.concatenate([jnp.arange(bs) + bs - 1, jnp.arange(bs)])
    logp = jax.nn.log_softmax(logits, axis=-1)
    return -jnp.mean(jnp.take_along_axis(logp, labels[:, None], axis=1))


if __name__ == "__main__":
    key = jax.random.PRNGKey(0)
    k1, k2 = jax.random.split(key)
    bs, feat = 8, 32
    out1 = jax.random.normal(k1, (bs, feat), dtype=jnp.float32)
    out2 = jax.random.normal(k2, (bs, feat), dtype=jnp.float32)

    loss = jax.block_until_ready(ntxent_loss(out1, out2, temperature=0.5))
    ref = jax.block_until_ready(_ntxent_ref(out1, out2, temperature=0.5))

    assert jnp.isfinite(loss), "loss is not finite"
    # bf16 MXU inputs (f32 accumulation / softmax) introduce small drift vs.
    # the full-f32 reference; numerator/denominator are now both bf16-rounded.
    assert abs(float(loss) - float(ref)) < 3e-2, (float(loss), float(ref))
    print("KERNEL_OK")
</pallas_src>

<mosaic_0001>
module attributes {stable_mosaic.version = 11 : i64} {
  func.func @_prep_kernel(%arg0: i32, %arg1: memref<16x32xf32, #tpu.memory_space<vmem>>, %arg2: memref<16x32xf32, #tpu.memory_space<vmem>>, %arg3: memref<2x16x32xbf16, #tpu.memory_space<vmem>>, %arg4: memref<16x1xf32, #tpu.memory_space<vmem>>) attributes {dimension_semantics = [#tpu.dimension_semantics<parallel>], iteration_bounds = array<i64: 1>, scalar_prefetch = 0 : i64, scratch_operands = 0 : i64, tpu.core_type = #tpu.core_type<tc>, window_params = [{transform_indices = @transform_0, window_bounds = array<i64: 16, 32>}, {transform_indices = @transform_1, window_bounds = array<i64: 16, 32>}, {transform_indices = @transform_2, window_bounds = array<i64: 2, 16, 32>}, {transform_indices = @transform_3, window_bounds = array<i64: 16, 1>}]} {
    %c0 = arith.constant 0 : index
    %c0_0 = arith.constant 0 : index
    %0 = vector.load %arg1[%c0, %c0_0] : memref<16x32xf32, #tpu.memory_space<vmem>>, vector<16x32xf32>
    %c0_1 = arith.constant 0 : index
    %c0_2 = arith.constant 0 : index
    %1 = vector.load %arg2[%c0_1, %c0_2] : memref<16x32xf32, #tpu.memory_space<vmem>>, vector<16x32xf32>
    %2 = arith.mulf %0, %0 : vector<16x32xf32>
    %cst = arith.constant dense<0.000000e+00> : vector<16xf32>
    %3 = vector.multi_reduction <add>, %2, %cst [1] : vector<16x32xf32> to vector<16xf32>
    %4 = vector.shape_cast %3 : vector<16xf32> to vector<16x1xf32>
    %cst_3 = arith.constant 1.000000e-24 : f32
    %5 = vector.broadcast %cst_3 : f32 to vector<16x1xf32>
    %6 = arith.maximumf %4, %5 : vector<16x1xf32>
    %7 = math.rsqrt %6 : vector<16x1xf32>
    %8 = arith.mulf %1, %1 : vector<16x32xf32>
    %cst_4 = arith.constant dense<0.000000e+00> : vector<16xf32>
    %9 = vector.multi_reduction <add>, %8, %cst_4 [1] : vector<16x32xf32> to vector<16xf32>
    %10 = vector.shape_cast %9 : vector<16xf32> to vector<16x1xf32>
    %cst_5 = arith.constant 1.000000e-24 : f32
    %11 = vector.broadcast %cst_5 : f32 to vector<16x1xf32>
    %12 = arith.maximumf %10, %11 : vector<16x1xf32>
    %13 = math.rsqrt %12 : vector<16x1xf32>
    %14 = vector.broadcast %7 : vector<16x1xf32> to vector<16x32xf32>
    %15 = arith.mulf %0, %14 : vector<16x32xf32>
    %16 = arith.truncf %15 : vector<16x32xf32> to vector<16x32xbf16>
    %17 = vector.broadcast %13 : vector<16x1xf32> to vector<16x32xf32>
    %18 = arith.mulf %1, %17 : vector<16x32xf32>
    %19 = arith.truncf %18 : vector<16x32xf32> to vector<16x32xbf16>
    %c0_6 = arith.constant 0 : index
    %c0_7 = arith.constant 0 : index
    %c0_8 = arith.constant 0 : index
    %20 = vector.load %arg3[%c0_6, %c0_7, %c0_8] : memref<2x16x32xbf16, #tpu.memory_space<vmem>>, vector<1x16x32xbf16>
    %21 = vector.shape_cast %20 : vector<1x16x32xbf16> to vector<16x32xbf16>
    %22 = vector.shape_cast %16 : vector<16x32xbf16> to vector<1x16x32xbf16>
    tpu.vector_store %arg3[%c0_6, %c0_7, %c0_8], %22 {strides = array<i32>} : memref<2x16x32xbf16, #tpu.memory_space<vmem>>, vector<1x16x32xbf16>,
    %c1 = arith.constant 1 : index
    %c0_9 = arith.constant 0 : index
    %c0_10 = arith.constant 0 : index
    %23 = vector.load %arg3[%c1, %c0_9, %c0_10] : memref<2x16x32xbf16, #tpu.memory_space<vmem>>, vector<1x16x32xbf16>
    %24 = vector.shape_cast %23 : vector<1x16x32xbf16> to vector<16x32xbf16>
    %25 = vector.shape_cast %19 : vector<16x32xbf16> to vector<1x16x32xbf16>
    tpu.vector_store %arg3[%c1, %c0_9, %c0_10], %25 {strides = array<i32>} : memref<2x16x32xbf16, #tpu.memory_space<vmem>>, vector<1x16x32xbf16>,
    %26 = arith.extf %16 : vector<16x32xbf16> to vector<16x32xf32>
    %27 = arith.extf %19 : vector<16x32xbf16> to vector<16x32xf32>
    %28 = arith.mulf %26, %27 : vector<16x32xf32>
    %cst_11 = arith.constant dense<0.000000e+00> : vector<16xf32>
    %29 = vector.multi_reduction <add>, %28, %cst_11 [1] : vector<16x32xf32> to vector<16xf32>
    %30 = vector.shape_cast %29 : vector<16xf32> to vector<16x1xf32>
    %cst_12 = arith.constant 2.000000e+00 : f32
    %31 = vector.broadcast %cst_12 : f32 to vector<16x1xf32>
    %32 = arith.mulf %30, %31 : vector<16x1xf32>
    %c0_13 = arith.constant 0 : index
    %c0_14 = arith.constant 0 : index
    %33 = vector.load %arg4[%c0_13, %c0_14] : memref<16x1xf32, #tpu.memory_space<vmem>>, vector<16x1xf32>
    tpu.vector_store %arg4[%c0_13, %c0_14], %32 {strides = array<i32>} : memref<16x1xf32, #tpu.memory_space<vmem>>, vector<16x1xf32>,
    return
  }
  func.func @transform_0(%arg0: i32) -> (i32, i32) {
    %c0_i32 = arith.constant 0 : i32
    %c0_i32_0 = arith.constant 0 : i32
    return %arg0, %c0_i32 : i32, i32
  }
  func.func @transform_1(%arg0: i32) -> (i32, i32) {
    %c0_i32 = arith.constant 0 : i32
    %c0_i32_0 = arith.constant 0 : i32
    return %arg0, %c0_i32 : i32, i32
  }
  func.func @transform_2(%arg0: i32) -> (i32, i32, i32) {
    %c0_i32 = arith.constant 0 : i32
    %c0_i32_0 = arith.constant 0 : i32
    %c0_i32_1 = arith.constant 0 : i32
    return %c0_i32, %arg0, %c0_i32_0 : i32, i32, i32
  }
  func.func @transform_3(%arg0: i32) -> (i32, i32) {
    %c0_i32 = arith.constant 0 : i32
    %c0_i32_0 = arith.constant 0 : i32
    return %arg0, %c0_i32 : i32, i32
  }
}

module attributes {stable_mosaic.version = 11 : i64} {
  func.func @_ntxent_lse_kernel(%arg0: i32, %arg1: i32, %arg2: memref<16x32xbf16, #tpu.memory_space<vmem>>, %arg3: memref<16x32xbf16, #tpu.memory_space<vmem>>, %arg4: memref<16x1xf32, #tpu.memory_space<vmem>>, %arg5: memref<16x1xf32, #tpu.memory_space<vmem>>) attributes {dimension_semantics = [#tpu.dimension_semantics<parallel>, #tpu.dimension_semantics<arbitrary>], iteration_bounds = array<i64: 2, 2>, scalar_prefetch = 0 : i64, scratch_operands = 1 : i64, tpu.core_type = #tpu.core_type<tc>, window_params = [{transform_indices = @transform_0, window_bounds = array<i64: 16, 32>}, {transform_indices = @transform_1, window_bounds = array<i64: 16, 32>}, {transform_indices = @transform_2, window_bounds = array<i64: 16, 1>}]} {
    %c0 = arith.constant 0 : index
    %c0_0 = arith.constant 0 : index
    %0 = vector.load %arg2[%c0, %c0_0] : memref<16x32xbf16, #tpu.memory_space<vmem>>, vector<16x32xbf16>
    %c0_1 = arith.constant 0 : index
    %c0_2 = arith.constant 0 : index
    %1 = vector.load %arg3[%c0_1, %c0_2] : memref<16x32xbf16, #tpu.memory_space<vmem>>, vector<16x32xbf16>
    %cst = arith.constant dense<0.000000e+00> : vector<16x16xf32>
    %2 = tpu.matmul %0, %1, %cst {dimension_numbers = #tpu.dot_dimension_numbers<[1], [1], [0], [0], [0, 0, 1, 0], [], []>} : vector<16x32xbf16>, vector<16x32xbf16>, vector<16x16xf32> -> vector<16x16xf32>
    %cst_3 = arith.constant 2.000000e+00 : f32
    %3 = vector.broadcast %cst_3 : f32 to vector<16x16xf32>
    %4 = arith.mulf %2, %3 : vector<16x16xf32>
    %c16_i32 = arith.constant 16 : i32
    %5 = arith.muli %arg0, %c16_i32 : i32
    %6 = tpu.iota {dimensions = array<i32: 0>} : vector<16x1xi32>
    %7 = vector.broadcast %5 : i32 to vector<16x1xi32>
    %8 = arith.addi %7, %6 : vector<16x1xi32>
    %c16_i32_4 = arith.constant 16 : i32
    %9 = arith.muli %arg1, %c16_i32_4 : i32
    %10 = tpu.iota {dimensions = array<i32: 1>} : vector<1x16xi32>
    %11 = vector.broadcast %9 : i32 to vector<1x16xi32>
    %12 = arith.addi %11, %10 : vector<1x16xi32>
    %13 = vector.broadcast %8 : vector<16x1xi32> to vector<16x16xi32>
    %14 = vector.broadcast %12 : vector<1x16xi32> to vector<16x16xi32>
    %15 = arith.cmpi ne, %13, %14 : vector<16x16xi32>
    %c8_i32 = arith.constant 8 : i32
    %16 = vector.broadcast %c8_i32 : i32 to vector<1x16xi32>
    %17 = arith.cmpi slt, %12, %16 : vector<1x16xi32>
    %c16_i32_5 = arith.constant 16 : i32
    %18 = vector.broadcast %c16_i32_5 : i32 to vector<1x16xi32>
    %19 = arith.cmpi sge, %12, %18 : vector<1x16xi32>
    %c24_i32 = arith.constant 24 : i32
    %20 = vector.broadcast %c24_i32 : i32 to vector<1x16xi32>
    %21 = arith.cmpi slt, %12, %20 : vector<1x16xi32>
    %22 = arith.andi %19, %21 : vector<1x16xi1>
    %23 = arith.ori %17, %22 : vector<1x16xi1>
    %24 = vector.broadcast %23 : vector<1x16xi1> to vector<16x16xi1>
    %25 = arith.andi %15, %24 : vector<16x16xi1>
    %cst_6 = arith.constant -1.000000e+30 : f32
    %26 = vector.broadcast %cst_6 : f32 to vector<16x16xf32>
    %27 = arith.select %25, %4, %26 : vector<16x16xi1>, vector<16x16xf32>
    %c0_i32 = arith.constant 0 : i32
    %28 = arith.cmpi eq, %arg1, %c0_i32 : i32
    %29 = arith.extui %28 : i1 to i32
    %c0_i32_7 = arith.constant 0 : i32
    %30 = arith.cmpi ne, %29, %c0_i32_7 : i32
    scf.if %30 {
      %cst_15 = arith.constant 0.000000e+00 : f32
      %42 = vector.broadcast %cst_15 : f32 to vector<16x1xf32>
      %c0_16 = arith.constant 0 : index
      %c0_17 = arith.constant 0 : index
      %43 = vector.load %arg5[%c0_16, %c0_17] : memref<16x1xf32, #tpu.memory_space<vmem>>, vector<16x1xf32>
      tpu.vector_store %arg5[%c0_16, %c0_17], %42 {strides = array<i32>} : memref<16x1xf32, #tpu.memory_space<vmem>>, vector<16x1xf32>,
    } else {
    }
    %c0_8 = arith.constant 0 : index
    %c0_9 = arith.constant 0 : index
    %31 = vector.load %arg5[%c0_8, %c0_9] : memref<16x1xf32, #tpu.memory_space<vmem>>, vector<16x1xf32>
    %cst_10 = arith.constant 2.000000e+00 : f32
    %32 = vector.broadcast %cst_10 : f32 to vector<16x16xf32>
    %33 = arith.subf %27, %32 : vector<16x16xf32>
    %34 = math.exp %33 : vector<16x16xf32>
    %cst_11 = arith.constant dense<0.000000e+00> : vector<16xf32>
    %35 = vector.multi_reduction <add>, %34, %cst_11 [1] : vector<16x16xf32> to vector<16xf32>
    %36 = vector.shape_cast %35 : vector<16xf32> to vector<16x1xf32>
    %37 = arith.addf %31, %36 : vector<16x1xf32>
    %c0_12 = arith.constant 0 : index
    %c0_13 = arith.constant 0 : index
    %38 = vector.load %arg5[%c0_12, %c0_13] : memref<16x1xf32, #tpu.memory_space<vmem>>, vector<16x1xf32>
    tpu.vector_store %arg5[%c0_12, %c0_13], %37 {strides = array<i32>} : memref<16x1xf32, #tpu.memory_space<vmem>>, vector<16x1xf32>,
    %c1_i32 = arith.constant 1 : i32
    %39 = arith.cmpi eq, %arg1, %c1_i32 : i32
    %40 = arith.extui %39 : i1 to i32
    %c0_i32_14 = arith.constant 0 : i32
    %41 = arith.cmpi ne, %40, %c0_i32_14 : i32
    scf.if %41 {
      %c0_15 = arith.constant 0 : index
      %c0_16 = arith.constant 0 : index
      %42 = vector.load %arg5[%c0_15, %c0_16] : memref<16x1xf32, #tpu.memory_space<vmem>>, vector<16x1xf32>
      %43 = math.log %42 : vector<16x1xf32>
      %cst_17 = arith.constant 2.000000e+00 : f32
      %44 = vector.broadcast %cst_17 : f32 to vector<16x1xf32>
      %45 = arith.addf %44, %43 : vector<16x1xf32>
      %c0_18 = arith.constant 0 : index
      %c0_19 = arith.constant 0 : index
      %46 = vector.load %arg4[%c0_18, %c0_19] : memref<16x1xf32, #tpu.memory_space<vmem>>, vector<16x1xf32>
      tpu.vector_store %arg4[%c0_18, %c0_19], %45 {strides = array<i32>} : memref<16x1xf32, #tpu.memory_space<vmem>>, vector<16x1xf32>,
    } else {
    }
    return
  }
  func.func @transform_0(%arg0: i32, %arg1: i32) -> (i32, i32) {
    %c0_i32 = arith.constant 0 : i32
    %c0_i32_0 = arith.constant 0 : i32
    return %arg0, %c0_i32 : i32, i32
  }
  func.func @transform_1(%arg0: i32, %arg1: i32) -> (i32, i32) {
    %c0_i32 = arith.constant 0 : i32
    %c0_i32_0 = arith.constant 0 : i32
    return %arg1, %c0_i32 : i32, i32
  }
  func.func @transform_2(%arg0: i32, %arg1: i32) -> (i32, i32) {
    %c0_i32 = arith.constant 0 : i32
    %c0_i32_0 = arith.constant 0 : i32
    return %arg0, %c0_i32 : i32, i32
  }
}

</mosaic_0001>

<bundles_post_ra>
// kernel: ntxent_loss.2
= control target key start
LH: loop header
LB: loop body
LE: loop exit
PB: predicated region body
PF: predicated region fallthrough
CT: control target
= control target key end

     0   :  { %vm19_vm0 = vcmask 261120   ;;  %vm55_vm1 = vcmask 257024   ;;  %vm82_vm2 = vcmask 7168   ;;  %s171_s1 = inlined_call_operand.vmem [shape: f32[16,32], index: 1, kind: input, shape index: {}]   ;;  %s172_s0 = inlined_call_operand.vmem [shape: f32[16,32], index: 0, kind: input, shape index: {}]   ;;  %s173_s2 = inlined_call_operand.vmem [shape: bf16[2,16,32], index: 2, kind: output, shape index: {0}]   ;;  %s174_s3 = inlined_call_operand.vmem [shape: f32[16,1], index: 3, kind: output, shape index: {1}]  }
   0x1   :  { %v15_v0 = vld [vmem:[%s171_s1] sm:$0xff]  ;;  %v16_v2 = vld [vmem:[%s171_s1 + $0x8] sm:$0xff] }
   0x2   :  { %v13_v1 = vld [vmem:[%s172_s0] sm:$0xff]  ;;  %v30_v3 = vmul.f32 %v15_v0, %v15_v0  ;;  %v31_v5 = vmul.f32 %v16_v2, %v16_v2  ;;  %v14_v6 = vld [vmem:[%s172_s0 + $0x8] sm:$0xff] }
   0x3   :  { %v17_v4 = vmul.f32 %v13_v1, %v13_v1  ;;  %v18_v7 = vmul.f32 %v14_v6, %v14_v6 }
   0x4   :  { %v32_v8 = vsel %vm19_vm0, %v30_v3, 0.0  ;;  %v35_v10 = vsel %vm19_vm0, %v31_v5, 0.0 }
   0x5   :  { %v20_v9 = vsel %vm19_vm0, %v17_v4, 0.0  ;;  %33 = vadd.xlane.f32.xlu1 %v32_v8  ;;  %v23_v11 = vsel %vm19_vm0, %v18_v7, 0.0 }
   0x6   :  { %21 = vadd.xlane.f32.xlu0 %v20_v9 }
   0x9   :  { %36 = vadd.xlane.f32.xlu1 %v35_v10 }
   0xa   :  { %24 = vadd.xlane.f32.xlu0 %v23_v11 }
  0x92   :  { %v34_v12 = vpop.xlane.xlu1 %33 }
  0x93   :  { %v22_v13 = vpop.xlane.xlu0 %21  ;;  %v38_v14 = vmax.f32 %v34_v12, 1e-24 }
  0x94   :  { %v26_v15 = vmax.f32 %v22_v13, 1e-24 }
  0x95   :  { %103 = vrsqrt.f32 %v38_v14 }
  0x96   :  { %105 = vrsqrt.f32 %v26_v15  ;;  %v37_v16 = vpop.xlane.xlu1 %36 }
  0x97   :  { %v25_v17 = vpop.xlane.xlu0 %24  ;;  %v39_v18 = vmax.f32 %v37_v16, 1e-24 }
  0x98   :  { %v27_v19 = vmax.f32 %v25_v17, 1e-24 }
  0x99   :  { %107 = vrsqrt.f32 %v39_v18 }
  0x9a   :  { %109 = vrsqrt.f32 %v27_v19 }
  0x9f   :  { %v104_v20 = vpop.eup %103 }
  0xa0   :  { %v106_v21 = vpop.eup %105  ;;  %v45_v22 = vmul.f32 %v104_v20, %v15_v0 }
  0xa1   :  { %v42_v23 = vmul.f32 %v106_v21, %v13_v1 }
  0xa2   :  { %v101_v24 = vpack.c.bf16 %v45_v22, %v45_v22 }
  0xa3   :  { %v108_v25 = vpop.eup %107  ;;  %v99_v26 = vpack.c.bf16 %v42_v23, %v42_v23 }
  0xa4   :  { %v110_v27 = vpop.eup %109  ;;  %v46_v28 = vmul.f32 %v108_v25, %v16_v2  ;;  %97 = vst.msk [vmem:[%s173_s2 + $0x8] sm:$0xf] %vm55_vm1, %v101_v24 }
  0xa5   :  { %v43_v29 = vmul.f32 %v110_v27, %v14_v6  ;;  %56 = vst.msk [vmem:[%s173_s2] sm:$0xf] %vm55_vm1, %v99_v26 }
  0xa6   :  { %v47_v30 = vpack.c.bf16 %v46_v28, %v45_v22  ;;  %v102_v31 = vpack.c.bf16 %v46_v28, %v46_v28 }
  0xa7   :  { %v44_v32 = vpack.c.bf16 %v43_v29, %v42_v23  ;;  %v100_v33 = vpack.c.bf16 %v43_v29, %v43_v29 }
  0xa8   :  { %98 = vst.msk [vmem:[%s173_s2 + $0xc] sm:$0xf] %vm55_vm1, %v102_v31  ;;  %v71_v34 = vunpack.c.h.bf16 %v47_v30  ;;  %v70_v35 = vunpack.c.l.bf16 %v47_v30 }
  0xa9   :  { %57 = vst.msk [vmem:[%s173_s2 + $0x4] sm:$0xf] %vm55_vm1, %v100_v33  ;;  %v69_v36 = vunpack.c.h.bf16 %v44_v32  ;;  %v68_v37 = vunpack.c.l.bf16 %v44_v32 }
  0xab   :  { %v73_v38 = vmul.f32 %v71_v34, %v69_v36  ;;  %v72_v39 = vmul.f32 %v70_v35, %v68_v37 }
  0xad   :  { %v77_v40 = vsel %vm19_vm0, %v73_v38, 0.0  ;;  %v74_v41 = vsel %vm19_vm0, %v72_v39, 0.0 }
  0xae   :  { %78 = vadd.xlane.f32.xlu1 %v77_v40  ;;  %75 = vadd.xlane.f32.xlu0 %v74_v41 }
 0x13b   :  { %v79_v42 = vpop.xlane.xlu1 %78  ;;  %v76_v43 = vpop.xlane.xlu0 %75 }
 0x13c   :  { %v81_v44 = vmul.f32 2.0, %v79_v42  ;;  %v80_v45 = vmul.f32 2.0, %v76_v43 }
 0x13e   :  { %84 = vst.msk [vmem:[%s174_s3 + $0x8] sm:$0xff] %vm82_vm2, %v81_v44  ;;  %83 = vst.msk [vmem:[%s174_s3] sm:$0xff] %vm82_vm2, %v80_v45 }

// kernel: ntxent_loss.3
= control target key start
LH: loop header
LB: loop body
LE: loop exit
PB: predicated region body
PF: predicated region fallthrough
CT: control target
= control target key end

     0   :  { %s533_s9 = smov 0   ;;  %s535_s10 = smov 0   ;;  %s611_s0 = inlined_call_operand.vmem [shape: bf16[32,32], index: 0, kind: input, shape index: {}, may-alias: {0,1}]   ;;  %s612_s1 = inlined_call_operand.vmem [shape: bf16[32,32], index: 1, kind: input, shape index: {}, may-alias: {0,1}]   ;;  %s613_s2 = inlined_call_operand.vmem [shape: f32[32,1], index: 2, kind: output, shape index: {}]  }
   0x1   :  { %s537_s11 = smov 0   ;;  %s539_s12 = smov 0  }
   0x2   :  { %s541_s13 = smov 0  }
   0x3 LB: > { %s21_s14 = sadd.s32 1, %s505_s11  ;;  %s24_s15 = sadd.s32 1, %s509_s12  ;;  %s513_s13 = sphi %s541_s13, %s12_s13   ;;  %s509_s12 = sphi %s539_s12, %s619_s12   ;;  %s505_s11 = sphi %s537_s11, %s618_s11   ;;  %s501_s10 = sphi %s535_s10, %s617_s10   ;;  %s497_s9 = sphi %s533_s9, %s616_s9  }
   0x4   : > { %p22_p0 = scmp.ge.s32.totalorder %s21_s14, 2  ;;  %p396_p1 = scmp.ge.s32.totalorder %s513_s13, 1 }
   0x5   : > { %p136_p2 = scmp.lt.s32.totalorder %s513_s13, 5 }
   0x6   : > { %s621_s14 = smov (%p22_p0, %s21_s14), 0  ;;  %s623_s15 = smov (!%p22_p0, %s24_s15), %s509_s12 }
   0x7   : > { %p137_p3 = pnand %p396_p1, %p136_p2  ;;  %p26_p4 = scmp.ge.s32.totalorder %s623_s15, 2 }
   0x8   : > { %s399_s16 = sshll.u32 (!%p137_p3), %s497_s9, 1  ;;  %s397_s17 = sshll.u32 (!%p137_p3), %s501_s10, 1  ;;  %v515_v0 = vmov (!%p137_p3), 0.0   ;;  %vm516_vm0 = vmmov (!%p137_p3), 0   ;;  %vm196_vm1 = vcmask (!%p137_p3), 261120   ;;  %v247_v4 = vlaneseq (!%p137_p3) }
   0x9   : > { %s625_s15 = smov (%p26_p4, %s623_s15), 0  ;;  %140 = sbr.rel (%p137_p3) target bundleno = 433 (0x1b1), region = 28 }
   0xa   : > { %416 = vmatprep.subr.bf16.mxu0 (!%p137_p3), %v515_v0  ;;  %p170_p5 = scmp.lt.s32.totalorder (!%p137_p3), %s399_s16, 3  ;;  %418 = vmatprep.mubr.msk.bf16.mxu0 (!%p137_p3), %vm516_vm0, %v515_v0  ;;  %p164_p6 = scmp.lt.s32.totalorder (!%p137_p3), %s397_s17, 3  ;;  %v255_v5 = vand.u32 (!%p137_p3), 127, %v247_v4  ;;  %v248_v7 = vshrl.u32 (!%p137_p3), %v247_v4, 7 }
   0xb   : > { %s407_s30 = sshll.u32 (!%p137_p3), %s497_s9, 4  ;;  %s406_s3 = sshll.u32 (!%p137_p3), %s501_s10, 4 }
   0xc   : > { %v256_v6 = vstv (!%p137_p3), %s407_s30  ;;  %v250_v9 = vstv (!%p137_p3), %s406_s3  ;;  %v249_v10 = vadd.s32 (!%p137_p3), 8, %v248_v7  ;;  %p408_p7 = scmp.ne.s32.totalorder (!%p137_p3), %s497_s9, 0 }
   0xd   : > { %v257_v8 = vadd.s32 (!%p137_p3), %v256_v6, %v255_v5  ;;  %v251_v11 = vadd.s32 (!%p137_p3), %v250_v9, %v248_v7 }
   0xe   : > { %v252_v12 = vadd.s32 (!%p137_p3), %v250_v9, %v249_v10 }
   0xf   : > { %vm261_vm2 = vcmp.ge.s32.totalorder (!%p137_p3), %v257_v8, 16  ;;  %vm262_vm3 = vcmp.lt.s32.totalorder (!%p137_p3), %v257_v8, 24  ;;  %vm260_vm4 = vcmp.lt.s32.totalorder (!%p137_p3), %v257_v8, 8  ;;  %vm258_vm6 = vcmp.ne.s32.totalorder (!%p137_p3), %v251_v11, %v257_v8 }
  0x10   : > { %s627_s16 = smov (!%p170_p5, %s399_s16), 3  ;;  %s629_s17 = smov (!%p164_p6, %s397_s17), 3  ;;  %vm263_vm5 = vmand %vm261_vm2, %vm262_vm3  ;;  %vm259_vm8 = vcmp.ne.s32.totalorder %v252_v12, %v257_v8 }
  0x11   : > { %s400_s18 = sshll.u32 %s627_s16, 2  ;;  %s398_s22 = sshll.u32 %s629_s17, 2  ;;  %vm264_vm7 = vmor %vm260_vm4, %vm263_vm5  ;;  %vm275_vm11 = vcmask (!%p408_p7), 7168   ;;  %v517_v22 = vmov (!%p408_p7), 0.0  }
  0x12   : > { %s173_s21 = scalar_lea.vmem %s612_s1, %s400_s18  ;;  %s167_s25 = scalar_lea.vmem %s611_s0, %s398_s22  ;;  %vm582_vm9 = vmand %vm258_vm6, %vm264_vm7  ;;  %276 = vst.msk [vmem:[#allocation2] sm:$0xff] (!%p408_p7), %vm275_vm11, %v517_v22 }
  0x13   : > { %v465_v1 = vld [vmem:[%s173_s21] sm:$0xff]   ;;  %s402_s26 = sshll.u32 %s629_s17, 3  ;;  %vm268_vm10 = vmand %vm259_vm8, %vm264_vm7  ;;  %277 = vst.msk [vmem:[#allocation2 + $0x8] sm:$0xff] (!%p408_p7), %vm275_vm11, %v517_v22 }
  0x14   : > { %s578_s29 = scalar_lea.vmem %s613_s2, %s402_s26  ;;  %v201_v2 = vsel %vm196_vm1, %v465_v1, 0  ;;  %v466_v3 = vld [vmem:[%s167_s25] sm:$0xff]  }
  0x15   : > { %417 = vmatpush3.bf16.xpose.msra.mxu0 %v201_v2 }
  0x1c   : > { %419 = vmatmul.mubr.msk.bf16.vlgmr.msra.gmra.mrb[0].mxu0 %vm196_vm1, %v466_v3 }
  0xee   : > { %274 = sbr.rel (%p408_p7) target bundleno = 245 (0xf5), region = 32 }
  0xef   : > { %v237_v13 = vpop.f32.mrb[0].mxu0 }
  0xf0   : > { %v244_v15 = vmul.f32 2.0, %v237_v13  ;;  %v420_v16 = vpop.f32.mrb[1].mxu0 }
  0xf1   : > { %v240_v17 = vpop.f32.mrb[2].mxu0 }
  0xf2   : > { %v269_v18 = vsel %vm582_vm9, %v244_v15, -1e+30  ;;  %v245_v19 = vmul.f32 2.0, %v240_v17  ;;  %v421_v20 = vpop.f32.mrb[3].mxu0 }
  0xf4   : > { %v270_v21 = vsel %vm268_vm10, %v245_v19, -1e+30 }
  0xf5 PF: > { %v409_v23 = vadd.f32 -2.0, %v269_v18  ;;  %v410_v24 = vadd.f32 -2.0, %v270_v21  ;;  %vm286_vm12 = vcmask 130048   ;;  %v278_v31 = vld [vmem:[#allocation2] sm:$0xff]  ;;  %vm295_vm13 = vcmask 7168   ;;  %v279_v34 = vld [vmem:[#allocation2 + $0x8] sm:$0xff] }
  0xf6   : > { %p411_p8 = scmp.ne.s32.totalorder %s497_s9, 1 }
  0xf7   : > { %v282_v25 = vmul.f32 1.442695, %v409_v23  ;;  %v284_v26 = vmul.f32 1.442695, %v410_v24 }
  0xf9   : > { %467 = vpow2.f32 %v282_v25 }
  0xfa   : > { %469 = vpow2.f32 %v284_v26 }
 0x103   : > { %v468_v27 = vpop.eup %467 }
 0x104   : > { %v470_v28 = vpop.eup %469  ;;  %v287_v29 = vsel %vm286_vm12, %v468_v27, 0.0 }
 0x105   : > { %288 = vadd.xlane.f32.xlu0 %v287_v29  ;;  %v290_v30 = vsel %vm286_vm12, %v470_v28, 0.0 }
 0x109   : > { %291 = vadd.xlane.f32.xlu0 %v290_v30 }
 0x192   : > { %v289_v32 = vpop.xlane.xlu0 %288 }
 0x193   : > { %v293_v33 = vadd.f32 %v289_v32, %v278_v31  ;;  %301 = sbr.rel (%p411_p8) target bundleno = 433 (0x1b1), region = 36 }
 0x195   : > { %296 = vst.msk [vmem:[#allocation2] sm:$0xff] %vm295_vm13, %v293_v33 }
 0x196   : > { %v292_v35 = vpop.xlane.xlu0 %291 }
 0x197   : > { %v294_v36 = vadd.f32 %v292_v35, %v279_v34 }
 0x199   : > { %297 = vst.msk [vmem:[#allocation2 + $0x8] sm:$0xff] %vm295_vm13, %v294_v36 }
 0x19c   : > { %v302_v37 = vld [vmem:[#allocation2] sm:$0xff] }
 0x19d   : > { %471 = vlog2.f32 %v302_v37 }
 0x1a0   : > { %v303_v38 = vld [vmem:[#allocation2 + $0x8] sm:$0xff] }
 0x1a1   : > { %473 = vlog2.f32 %v303_v38 }
 0x1a7   : > { %v472_v39 = vpop.eup %471 }
 0x1a8   : > { %v305_v41 = vmul.f32 0.6931472, %v472_v39 }
 0x1aa   : > { %v308_v43 = vadd.f32 2.0, %v305_v41 }
 0x1ab   : > { %v474_v40 = vpop.eup %473 }
 0x1ac   : > { %v307_v42 = vmul.f32 0.6931472, %v474_v40  ;;  %310 = vst.msk [vmem:[%s578_s29] sm:$0xff] %vm295_vm13, %v308_v43 }
 0x1ae   : > { %v309_v44 = vadd.f32 2.0, %v307_v42 }
 0x1b0   : > { %311 = vst.msk [vmem:[%s578_s29 + $0x8] sm:$0xff] %vm295_vm13, %v309_v44 }
 0x1b1 PF: > { %s12_s13 = sadd.s32 1, %s513_s13   ;;  %s616_s9 = smov %s505_s11 }
 0x1b2   : > { %p9_p9 = scmp.ge.s32.totalorder %s12_s13, 6   ;;  %s617_s10 = smov %s509_s12 }
 0x1b3   : > { %s618_s11 = smov %s621_s14  ;;  %s619_s12 = smov %s625_s15 }
 0x1b4   :  { %11 = sbr.rel (!%p9_p9) target bundleno = 3 (0x3), region = 69 }

</bundles_post_ra>
